<compile_context>
chip_gen: v7x
topology: tpu7x:2x2x1
jax: 0.10.0
libtpu: 0.0.40
codegen_flags: <defaults>
</compile_context>

<pallas_src>
import functools

import jax
import jax.numpy as jnp
from jax.experimental import pallas as pl
from jax.experimental.pallas import tpu as pltpu

HIDDEN_SIZE = 64
NUM_HIDDEN_LAYERS = 3
MAX_TILE = 256          # max batch-tile rows (well under VMEM on all gens)
OUT_LANES = 128         # lane-dense output width (real output is column 0)

# packed weight-slab layout (width = HIDDEN_SIZE lanes), all offsets 8-aligned
#   rows 0..3                      : w_in (4, 64)
#   rows 8+72*i .. 8+72*i+63       : w_h[i] (64, 64)
#   row  8+72*i+64                 : b_h[i] (1, 64)
#   row  B_IN_ROW (= 8 + 72*3)     : b_in (1, 64)
_H_BASE = lambda i: 8 + 72 * i
B_IN_ROW = 8 + 72 * NUM_HIDDEN_LAYERS            # 224
W_SLAB_ROWS = B_IN_ROW + 8                       # 232 (8-aligned)
# output slab (width = OUT_LANES): rows 0..63 = w_out, row 64 = b_out
WO_SLAB_ROWS = 72


def _mlp_kernel(x_ref, w_ref, wo_ref, o_ref):
    # x_ref: (TILE, 3) raw (px, py, theta) state, already f32
    x = x_ref[...]
    x0 = x[:, 0:1]
    x1 = x[:, 1:2]
    ang = x[:, 2:3]
    s = jnp.sin(ang)
    c = jnp.cos(ang)

    w_in = w_ref[0:4, :]                              # (4, 64)
    b_in = w_ref[B_IN_ROW:B_IN_ROW + 1, :]            # (1, 64)

    # input layer as four broadcast FMAs (no lane concat, no K=4 matmul)
    h = (x0 * w_in[0:1, :] + x1 * w_in[1:2, :]
         + s * w_in[2:3, :] + c * w_in[3:4, :] + b_in)

    # 3 hidden layers: MXU matmul + EUP tanh
    for i in range(NUM_HIDDEN_LAYERS):
        base = _H_BASE(i)
        w = w_ref[base:base + HIDDEN_SIZE, :]                       # (64, 64)
        b = w_ref[base + HIDDEN_SIZE:base + HIDDEN_SIZE + 1, :]     # (1, 64)
        h = jnp.tanh(jnp.dot(h, w, preferred_element_type=jnp.float32) + b)

    # output layer, lane-dense (padded to 128 lanes; real result in lane 0)
    w_out = wo_ref[0:HIDDEN_SIZE, :]                                # (64, 128)
    b_out = wo_ref[HIDDEN_SIZE:HIDDEN_SIZE + 1, :]                  # (1, 128)
    y = jnp.dot(h, w_out, preferred_element_type=jnp.float32) + b_out
    o_ref[...] = y.astype(o_ref.dtype)


def init_params(key, input_dim=3):
    """Parameter init mimicking torch.nn.Linear (uniform +-1/sqrt(fan_in))."""
    assert input_dim == 3, "this script implements the input_dim==3 construction"
    in_feats = input_dim + 1  # 3 -> 4 after sin/cos expansion
    ks = jax.random.split(key, 2 * (2 + NUM_HIDDEN_LAYERS))
    ki = iter(ks)

    def linear(kw, kb, fan_in, fan_out):
        bound = 1.0 / jnp.sqrt(fan_in)
        w = jax.random.uniform(kw, (fan_in, fan_out), jnp.float32, -bound, bound)
        b = jax.random.uniform(kb, (1, fan_out), jnp.float32, -bound, bound)
        return w, b

    w_in, b_in = linear(next(ki), next(ki), in_feats, HIDDEN_SIZE)
    w_hs, b_hs = [], []
    for _ in range(NUM_HIDDEN_LAYERS):
        w, b = linear(next(ki), next(ki), HIDDEN_SIZE, HIDDEN_SIZE)
        w_hs.append(w)
        b_hs.append(b)
    w_h = jnp.stack(w_hs)                       # (3, 64, 64)
    b_h = jnp.stack(b_hs)                       # (3, 1, 64)
    w_out, b_out = linear(next(ki), next(ki), HIDDEN_SIZE, 1)
    return dict(w_in=w_in, b_in=b_in, w_h=w_h, b_h=b_h, w_out=w_out, b_out=b_out)


def _pack_params(params):
    """Pack the 7 parameter arrays into two VMEM slabs (fewer tiny DMAs)."""
    w_slab = jnp.zeros((W_SLAB_ROWS, HIDDEN_SIZE), jnp.float32)
    w_slab = w_slab.at[0:4, :].set(params["w_in"])
    w_slab = w_slab.at[B_IN_ROW:B_IN_ROW + 1, :].set(params["b_in"])
    for i in range(NUM_HIDDEN_LAYERS):
        base = _H_BASE(i)
        w_slab = w_slab.at[base:base + HIDDEN_SIZE, :].set(params["w_h"][i])
        w_slab = w_slab.at[base + HIDDEN_SIZE:base + HIDDEN_SIZE + 1, :].set(
            params["b_h"][i])

    wo_slab = jnp.zeros((WO_SLAB_ROWS, OUT_LANES), jnp.float32)
    wo_slab = wo_slab.at[0:HIDDEN_SIZE, 0:1].set(params["w_out"])
    wo_slab = wo_slab.at[HIDDEN_SIZE:HIDDEN_SIZE + 1, 0:1].set(params["b_out"])
    return w_slab, wo_slab


def _round_up(n, m):
    return ((n + m - 1) // m) * m


def _choose_tile(B):
    """Pick a batch tile: big enough to amortize per-step overhead, and >=2
    grid steps for larger batches so v7x's two TensorCores are both used."""
    Bp = _round_up(B, 8)
    if Bp <= 128:
        return Bp                              # tiny batch: one tile
    if Bp <= 2 * MAX_TILE:
        return _round_up(-(-Bp // 2), 8)       # two tiles
    return MAX_TILE


@jax.jit
def mlp_forward(x, params):
    """x: (B, 3) float32 -> (B, 1) float32."""
    # TODO(synk): the torch forward silently skips input_layer when
    # x.shape[-1] != 3; only the ==3 path (the one used by the NMPC) is
    # implemented here.
    B, F = x.shape
    assert F == 3

    tile = _choose_tile(B)
    Bp = _round_up(B, tile)
    xp = jnp.pad(x, ((0, Bp - B), (0, 0)))
    w_slab, wo_slab = _pack_params(params)

    out = pl.pallas_call(
        _mlp_kernel,
        out_shape=jax.ShapeDtypeStruct((Bp, OUT_LANES), jnp.float32),
        grid_spec=pltpu.PrefetchScalarGridSpec(
            num_scalar_prefetch=0,
            grid=(Bp // tile,),
            in_specs=[
                pl.BlockSpec((tile, 3), lambda i: (i, 0)),                 # x tile
                pl.BlockSpec((W_SLAB_ROWS, HIDDEN_SIZE), lambda i: (0, 0)),  # weights
                pl.BlockSpec((WO_SLAB_ROWS, OUT_LANES), lambda i: (0, 0)),   # out layer
            ],
            out_specs=pl.BlockSpec((tile, OUT_LANES), lambda i: (i, 0)),
        ),
        compiler_params=pltpu.CompilerParams(
            dimension_semantics=("parallel",)),
    )(xp, w_slab, wo_slab)
    return out[:B, :1]


def mlp_forward_ref(x, params):
    """Pure-JAX reference mirroring the torch forward (for verification)."""
    ang = x[:, 2:3]
    x4 = jnp.concatenate([x[:, :2], jnp.sin(ang), jnp.cos(ang)], axis=-1)
    h = x4 @ params["w_in"] + params["b_in"]
    for i in range(NUM_HIDDEN_LAYERS):
        h = jnp.tanh(h @ params["w_h"][i] + params["b_h"][i])
    return h @ params["w_out"] + params["b_out"]


if __name__ == "__main__":
    key = jax.random.PRNGKey(0)
    k_param, k_x = jax.random.split(key)

    params = init_params(k_param, input_dim=3)

    # small batch of (px, py, theta) states (single-tile path)
    x_small = jax.random.normal(k_x, (8, 3), dtype=jnp.float32)
    y_small = mlp_forward(x_small, params)
    jax.block_until_ready(y_small)
    y_small_ref = mlp_forward_ref(x_small, params)
    assert y_small.shape == (8, 1)
    assert jnp.allclose(y_small, y_small_ref, atol=1e-5, rtol=1e-5), \
        "mismatch vs reference (small batch)"

    # larger batch to exercise the multi-tile (grid >= 2) path
    x_big = jax.random.normal(jax.random.fold_in(k_x, 1), (300, 3),
                              dtype=jnp.float32)
    y_big = mlp_forward(x_big, params)
    jax.block_until_ready(y_big)
    y_big_ref = mlp_forward_ref(x_big, params)
    assert y_big.shape == (300, 1)
    assert jnp.allclose(y_big, y_big_ref, atol=1e-5, rtol=1e-5), \
        "mismatch vs reference (multi-tile batch)"

    print("KERNEL_OK")
</pallas_src>

<mosaic_0001>
module attributes {stable_mosaic.version = 11 : i64} {
  func.func @_mlp_kernel(%arg0: i32, %arg1: memref<8x3xf32, #tpu.memory_space<vmem>>, %arg2: memref<232x64xf32, #tpu.memory_space<vmem>>, %arg3: memref<72x128xf32, #tpu.memory_space<vmem>>, %arg4: memref<8x128xf32, #tpu.memory_space<vmem>>) attributes {dimension_semantics = [#tpu.dimension_semantics<parallel>], iteration_bounds = array<i64: 1>, scalar_prefetch = 0 : i64, scratch_operands = 0 : i64, tpu.core_type = #tpu.core_type<tc>, window_params = [{transform_indices = @transform_0, window_bounds = array<i64: 8, 3>}, {pipeline_mode = #tpu.pipeline_mode<synchronous>, transform_indices = @transform_1, window_bounds = array<i64: 232, 64>}, {pipeline_mode = #tpu.pipeline_mode<synchronous>, transform_indices = @transform_2, window_bounds = array<i64: 72, 128>}, {transform_indices = @transform_3, window_bounds = array<i64: 8, 128>}]} {
    %c0 = arith.constant 0 : index
    %c0_0 = arith.constant 0 : index
    %0 = vector.load %arg1[%c0, %c0_0] : memref<8x3xf32, #tpu.memory_space<vmem>>, vector<8x3xf32>
    %1 = vector.extract_strided_slice %0 {offsets = [0, 0], sizes = [8, 1], strides = [1, 1]} : vector<8x3xf32> to vector<8x1xf32>
    %2 = vector.extract_strided_slice %0 {offsets = [0, 1], sizes = [8, 1], strides = [1, 1]} : vector<8x3xf32> to vector<8x1xf32>
    %3 = vector.extract_strided_slice %0 {offsets = [0, 2], sizes = [8, 1], strides = [1, 1]} : vector<8x3xf32> to vector<8x1xf32>
    %4 = math.sin %3 : vector<8x1xf32>
    %5 = math.cos %3 : vector<8x1xf32>
    %c0_1 = arith.constant 0 : index
    %c0_2 = arith.constant 0 : index
    %6 = vector.load %arg2[%c0_1, %c0_2] : memref<232x64xf32, #tpu.memory_space<vmem>>, vector<4x64xf32>
    %c224 = arith.constant 224 : index
    %c0_3 = arith.constant 0 : index
    %7 = vector.load %arg2[%c224, %c0_3] : memref<232x64xf32, #tpu.memory_space<vmem>>, vector<1x64xf32>
    %8 = vector.extract_strided_slice %6 {offsets = [0, 0], sizes = [1, 64], strides = [1, 1]} : vector<4x64xf32> to vector<1x64xf32>
    %9 = vector.broadcast %1 : vector<8x1xf32> to vector<8x64xf32>
    %10 = vector.broadcast %8 : vector<1x64xf32> to vector<8x64xf32>
    %11 = arith.mulf %9, %10 : vector<8x64xf32>
    %12 = vector.extract_strided_slice %6 {offsets = [1, 0], sizes = [1, 64], strides = [1, 1]} : vector<4x64xf32> to vector<1x64xf32>
    %13 = vector.broadcast %2 : vector<8x1xf32> to vector<8x64xf32>
    %14 = vector.broadcast %12 : vector<1x64xf32> to vector<8x64xf32>
    %15 = arith.mulf %13, %14 : vector<8x64xf32>
    %16 = arith.addf %11, %15 : vector<8x64xf32>
    %17 = vector.extract_strided_slice %6 {offsets = [2, 0], sizes = [1, 64], strides = [1, 1]} : vector<4x64xf32> to vector<1x64xf32>
    %18 = vector.broadcast %4 : vector<8x1xf32> to vector<8x64xf32>
    %19 = vector.broadcast %17 : vector<1x64xf32> to vector<8x64xf32>
    %20 = arith.mulf %18, %19 : vector<8x64xf32>
    %21 = arith.addf %16, %20 : vector<8x64xf32>
    %22 = vector.extract_strided_slice %6 {offsets = [3, 0], sizes = [1, 64], strides = [1, 1]} : vector<4x64xf32> to vector<1x64xf32>
    %23 = vector.broadcast %5 : vector<8x1xf32> to vector<8x64xf32>
    %24 = vector.broadcast %22 : vector<1x64xf32> to vector<8x64xf32>
    %25 = arith.mulf %23, %24 : vector<8x64xf32>
    %26 = arith.addf %21, %25 : vector<8x64xf32>
    %27 = vector.broadcast %7 : vector<1x64xf32> to vector<8x64xf32>
    %28 = arith.addf %26, %27 : vector<8x64xf32>
    %c8 = arith.constant 8 : index
    %c0_4 = arith.constant 0 : index
    %29 = vector.load %arg2[%c8, %c0_4] : memref<232x64xf32, #tpu.memory_space<vmem>>, vector<64x64xf32>
    %c72 = arith.constant 72 : index
    %c0_5 = arith.constant 0 : index
    %30 = vector.load %arg2[%c72, %c0_5] : memref<232x64xf32, #tpu.memory_space<vmem>>, vector<1x64xf32>
    %cst = arith.constant dense<0.000000e+00> : vector<8x64xf32>
    %31 = tpu.matmul %28, %29, %cst {dimension_numbers = #tpu.dot_dimension_numbers<[1], [0], [0], [1], [0, 0, 1, 1], [], []>} : vector<8x64xf32>, vector<64x64xf32>, vector<8x64xf32> -> vector<8x64xf32>
    %32 = vector.broadcast %30 : vector<1x64xf32> to vector<8x64xf32>
    %33 = arith.addf %31, %32 : vector<8x64xf32>
    %34 = math.tanh %33 : vector<8x64xf32>
    %c80 = arith.constant 80 : index
    %c0_6 = arith.constant 0 : index
    %35 = vector.load %arg2[%c80, %c0_6] : memref<232x64xf32, #tpu.memory_space<vmem>>, vector<64x64xf32>
    %c144 = arith.constant 144 : index
    %c0_7 = arith.constant 0 : index
    %36 = vector.load %arg2[%c144, %c0_7] : memref<232x64xf32, #tpu.memory_space<vmem>>, vector<1x64xf32>
    %cst_8 = arith.constant dense<0.000000e+00> : vector<8x64xf32>
    %37 = tpu.matmul %34, %35, %cst_8 {dimension_numbers = #tpu.dot_dimension_numbers<[1], [0], [0], [1], [0, 0, 1, 1], [], []>} : vector<8x64xf32>, vector<64x64xf32>, vector<8x64xf32> -> vector<8x64xf32>
    %38 = vector.broadcast %36 : vector<1x64xf32> to vector<8x64xf32>
    %39 = arith.addf %37, %38 : vector<8x64xf32>
    %40 = math.tanh %39 : vector<8x64xf32>
    %c152 = arith.constant 152 : index
    %c0_9 = arith.constant 0 : index
    %41 = vector.load %arg2[%c152, %c0_9] : memref<232x64xf32, #tpu.memory_space<vmem>>, vector<64x64xf32>
    %c216 = arith.constant 216 : index
    %c0_10 = arith.constant 0 : index
    %42 = vector.load %arg2[%c216, %c0_10] : memref<232x64xf32, #tpu.memory_space<vmem>>, vector<1x64xf32>
    %cst_11 = arith.constant dense<0.000000e+00> : vector<8x64xf32>
    %43 = tpu.matmul %40, %41, %cst_11 {dimension_numbers = #tpu.dot_dimension_numbers<[1], [0], [0], [1], [0, 0, 1, 1], [], []>} : vector<8x64xf32>, vector<64x64xf32>, vector<8x64xf32> -> vector<8x64xf32>
    %44 = vector.broadcast %42 : vector<1x64xf32> to vector<8x64xf32>
    %45 = arith.addf %43, %44 : vector<8x64xf32>
    %46 = math.tanh %45 : vector<8x64xf32>
    %c0_12 = arith.constant 0 : index
    %c0_13 = arith.constant 0 : index
    %47 = vector.load %arg3[%c0_12, %c0_13] : memref<72x128xf32, #tpu.memory_space<vmem>>, vector<64x128xf32>
    %c64 = arith.constant 64 : index
    %c0_14 = arith.constant 0 : index
    %48 = vector.load %arg3[%c64, %c0_14] : memref<72x128xf32, #tpu.memory_space<vmem>>, vector<1x128xf32>
    %cst_15 = arith.constant dense<0.000000e+00> : vector<8x128xf32>
    %49 = tpu.matmul %46, %47, %cst_15 {dimension_numbers = #tpu.dot_dimension_numbers<[1], [0], [0], [1], [0, 0, 1, 1], [], []>} : vector<8x64xf32>, vector<64x128xf32>, vector<8x128xf32> -> vector<8x128xf32>
    %50 = vector.broadcast %48 : vector<1x128xf32> to vector<8x128xf32>
    %51 = arith.addf %49, %50 : vector<8x128xf32>
    %c0_16 = arith.constant 0 : index
    %c0_17 = arith.constant 0 : index
    %52 = vector.load %arg4[%c0_16, %c0_17] : memref<8x128xf32, #tpu.memory_space<vmem>>, vector<8x128xf32>
    tpu.vector_store %arg4[%c0_16, %c0_17], %51 {strides = array<i32>} : memref<8x128xf32, #tpu.memory_space<vmem>>, vector<8x128xf32>,
    return
  }
  func.func @transform_0(%arg0: i32) -> (i32, i32) {
    %c0_i32 = arith.constant 0 : i32
    %c0_i32_0 = arith.constant 0 : i32
    return %arg0, %c0_i32 : i32, i32
  }
  func.func @transform_1(%arg0: i32) -> (i32, i32) {
    %c0_i32 = arith.constant 0 : i32
    %c0_i32_0 = arith.constant 0 : i32
    %c0_i32_1 = arith.constant 0 : i32
    return %c0_i32, %c0_i32_0 : i32, i32
  }
  func.func @transform_2(%arg0: i32) -> (i32, i32) {
    %c0_i32 = arith.constant 0 : i32
    %c0_i32_0 = arith.constant 0 : i32
    %c0_i32_1 = arith.constant 0 : i32
    return %c0_i32, %c0_i32_0 : i32, i32
  }
  func.func @transform_3(%arg0: i32) -> (i32, i32) {
    %c0_i32 = arith.constant 0 : i32
    %c0_i32_0 = arith.constant 0 : i32
    return %arg0, %c0_i32 : i32, i32
  }
}

</mosaic_0001>

<bundles_post_ra>
// kernel: mlp_forward.1
= control target key start
LH: loop header
LB: loop body
LE: loop exit
PB: predicated region body
PF: predicated region fallthrough
CT: control target
= control target key end

     0   :  { %v831_v0 = vmov 0   ;;  %v832_v2 = vmov 2   ;;  %v833_v7 = vmov 1   ;;  %v834_v8 = vmov 0.0|0.0   ;;  %s1030_s0 = inlined_call_operand.vmem [shape: f32[8,3], index: 0, kind: input, shape index: {}]   ;;  %s1031_s1 = inlined_call_operand.vmem [shape: f32[232,64], index: 1, kind: input, shape index: {}]   ;;  %s1032_s2 = inlined_call_operand.vmem [shape: f32[72,128], index: 2, kind: input, shape index: {}]   ;;  %s1033_s3 = inlined_call_operand.vmem [shape: f32[8,128], index: 3, kind: output, shape index: {}]  }
   0x1   :  { %817 = vset.pattern.permute.xlu0 %v831_v0  ;;  %v866_v1 = vld [vmem:[%s1030_s0] sm:$0xff]  ;;  %819 = vset.pattern.permute.xlu1 %v832_v2  ;;  %v271_v11 = vld [vmem:[%s1031_s1 + $0x8] sm:$0xff]  ;;  %v272_v12 = vld [vmem:[%s1031_s1 + $0x10] sm:$0xff]  ;;  %v835_v22 = vmov 683565275  }
   0x2   :  { %226 = vperm.xlu0 %817, %v866_v1   ;;  %v18_v3 = vand.u32 2139095040, %v866_v1  ;;  %v15_v5 = vand.u32 2147483647, %v866_v1  ;;  %753 = vmatprep.subr.bf16.mxu0 %v834_v8  ;;  %v273_v13 = vld [vmem:[%s1031_s1 + $0x18] sm:$0xff]  ;;  %v754_v14 = vpack.c.bf16 %v272_v12, %v271_v11  ;;  %v274_v15 = vld [vmem:[%s1031_s1 + $0x20] sm:$0xff]  ;;  %vm17_vm7 = vcmp.lt.s32.totalorder %v866_v1, 0 }
   0x3   :  { %765 = vmatprep.subr.bf16.mxu1 %v834_v8  ;;  %v757_v18 = vpack.c.bf16 %v274_v15, %v273_v13  ;;  %v836_v24 = vmov 2475754826   ;;  %v837_v26 = vmov 2131351028   ;;  %v838_v28 = vmov 2102212464  }
   0x4   :  { %v19_v4 = vshrl.u32 %v18_v3, 23  ;;  %v22_v10 = vand.u32 8388607, %v15_v5  ;;  %755 = vmatpush3.bf16.msra.mxu0 %v754_v14  ;;  %v839_v30 = vmov 920167782   ;;  %vm107_vm15 = vweird.f32 %v866_v1 }
   0x5   :  { %756 = vmatprep.subr.bf16.mxu0 %v834_v8  ;;  %v840_v37 = vmov 1326507024   ;;  %vm16_vm8 = vcmp.le.f32.partialorder %v15_v5, 0.7853982 }
   0x6   :  { %v624_v6 = vadd.s32 4294967169, %v19_v4  ;;  %818 = vset.pattern.permute.xlu0 %v833_v7  ;;  %v23_v20 = vor.u32 8388608, %v22_v10 }
   0x7   :  { %235 = vperm.xlu0 %818, %v866_v1  }
   0x8   :  { %v25_v9 = vadd.s32 1, %v624_v6  ;;  %758 = vmatpush3.bf16.msra.mxu0 %v757_v18  ;;  %v63_v39 = vshll.u32 %v23_v20, 8 }
   0x9   :  { %759 = vmatprep.subr.bf16.mxu0 %v834_v8 }
   0xa   :  { %vm26_vm0 = vcmp.gt.s32.totalorder %v25_v9, 0 }
   0xb   :  { %v27_v16 = vsel %vm26_vm0, %v25_v9, 0  ;;  %820 = vset.pattern.permute.xlu0 %v832_v2  ;;  %vm841_vm0 = vmmov 0  }
   0xc   :  { %v29_v17 = vand.u32 31, %v27_v16  ;;  %v28_v19 = vshrl.u32 %v27_v16, 5 }
   0xe   :  { %v30_v21 = vsub.s32 32, %v29_v17  ;;  %v32_v23 = vshll.u32 %v835_v22, %v29_v17  ;;  %v35_v25 = vshll.u32 %v836_v24, %v29_v17  ;;  %v38_v27 = vshll.u32 %v837_v26, %v29_v17 }
   0xf   :  { %v41_v29 = vshll.u32 %v838_v28, %v29_v17  ;;  %v44_v31 = vshll.u32 %v839_v30, %v29_v17  ;;  %vm47_vm1 = vcmp.lt.s32.totalorder %v28_v19, 1  ;;  %vm50_vm2 = vcmp.lt.s32.totalorder %v28_v19, 4 }
  0x10   :  { %v31_v32 = vshrl.u32 %v835_v22, %v30_v21  ;;  %v33_v33 = vshrl.u32 %v836_v24, %v30_v21  ;;  %v36_v34 = vshrl.u32 %v837_v26, %v30_v21  ;;  %v39_v35 = vshrl.u32 %v838_v28, %v30_v21 }
  0x11   :  { %v42_v36 = vshrl.u32 %v839_v30, %v30_v21  ;;  %v45_v38 = vshrl.u32 %v840_v37, %v30_v21  ;;  %vm48_vm3 = vcmp.lt.s32.totalorder %v28_v19, 2  ;;  %vm49_vm4 = vcmp.lt.s32.totalorder %v28_v19, 3 }
  0x12   :  { %v34_v40 = vor.u32 %v33_v33, %v32_v23  ;;  %v37_v41 = vor.u32 %v36_v34, %v35_v25  ;;  %v40_v42 = vor.u32 %v39_v35, %v38_v27 }
  0x13   :  { %v43_v43 = vor.u32 %v42_v36, %v41_v29  ;;  %v46_v44 = vor.u32 %v45_v38, %v44_v31 }
  0x14   :  { %v51_v45 = vsel %vm47_vm1, %v31_v32, %v34_v40  ;;  %v52_v46 = vsel %vm50_vm2, %v40_v42, 2102212464  ;;  %v55_v47 = vsel %vm47_vm1, %v34_v40, %v37_v41  ;;  %v59_v48 = vsel %vm47_vm1, %v37_v41, %v40_v42 }
  0x15   :  { %v53_v49 = vsel %vm49_vm4, %v37_v41, %v52_v46  ;;  %v56_v50 = vsel %vm50_vm2, %v43_v43, 920167782  ;;  %v60_v51 = vsel %vm50_vm2, %v46_v44, 1326507024  ;;  %v275_v44 = vld [vmem:[%s1031_s1 + $0x28] sm:$0xff]  ;;  %vm284_vm1 = vcmask 523264  }
  0x16   :  { %v57_v52 = vsel %vm49_vm4, %v40_v42, %v56_v50  ;;  %v61_v53 = vsel %vm49_vm4, %v43_v43, %v60_v51  ;;  %v54_v54 = vsel %vm48_vm3, %v51_v45, %v53_v49  ;;  %v276_v45 = vld [vmem:[%s1031_s1 + $0x30] sm:$0xff]  ;;  %v842_v50 = vmov 0.0  }
  0x17   :  { %v58_v55 = vsel %vm48_vm3, %v55_v47, %v57_v52  ;;  %v62_v56 = vsel %vm48_vm3, %v59_v48, %v61_v53  ;;  %v70_v61 = vmul.u32 %v63_v39, %v54_v54  ;;  %v760_v47 = vpack.c.bf16 %v276_v45, %v275_v44  ;;  %v278_v48 = vld [vmem:[%s1031_s1 + $0x40] sm:$0xff]  ;;  %693 = vmatprep.mubr.msk.f32.mxu0 %vm841_vm0, %v842_v50  ;;  %v359_v51 = vld [vmem:[%s1031_s1 + $0x50] sm:$0xff]  ;;  %v360_v52 = vld [vmem:[%s1031_s1 + $0x58] sm:$0xff] }
  0x18   :  { %v890_v57 = vmul.u32.u64.low %v63_v39, %v62_v56  ;;  %v891_v58 = vmul.u32.u64.high %v63_v39, %v62_v56, %v890_v57  ;;  %v893_v59 = vmul.u32.u64.low %v63_v39, %v58_v55  ;;  %v894_v60 = vmul.u32.u64.high %v63_v39, %v58_v55, %v893_v59  ;;  %712 = vmatprep.mubr.msk.f32.mxu1 %vm841_vm0, %v842_v50  ;;  %v635_v45 = vld [vmem:[%s1031_s1 + $0x90] ss:$0 sm:$0xff] }
  0x19   :  { %761 = vmatpush3.bf16.msra.mxu0 %v760_v47  ;;  %v766_v53 = vpack.c.bf16 %v360_v52, %v359_v51  ;;  %v229_v54 = vlaneseq  ;;  %v537_v52 = vld [vmem:[%s1032_s2 + $0x20] sm:$0xff] }
  0x1a   :  { %vm72_vm5 = vc.u32 %v891_v58, %v893_v59  ;;  %v73_v62 = vadd.s32 1, %v894_v60  ;;  %v71_v12 = vadd.s32 %v893_v59, %v891_v58  ;;  %762 = vmatprep.subr.bf16.mxu0 %v834_v8  ;;  %v222_v59 = vld [vmem:[%s1031_s1] sm:$0xf] }
  0x1b   :  { %767 = vmatpush3.bf16.msra.mxu1 %v766_v53  ;;  %v230_v55 = vshrl.u32 %v229_v54, 7  ;;  %v538_v53 = vld [vmem:[%s1032_s2 + $0x28] sm:$0xff] }
  0x1c   :  { %v74_v63 = vsel %vm72_vm5, %v73_v62, %v894_v60  ;;  %768 = vmatprep.subr.bf16.mxu1 %v834_v8  ;;  %v796_v54 = vpack.c.bf16 %v538_v53, %v537_v52 }
  0x1d   :  { %v75_v0 = vadd.s32 %v74_v63, %v70_v61  ;;  %v231_v57 = vsub.s32 0, %v230_v55  ;;  %v240_v58 = vsub.s32 1, %v230_v55  ;;  %v251_v60 = vsub.s32 2, %v230_v55 }
  0x1f   :  { %v76_v2 = vadd.s32 536870912, %v75_v0  ;;  %v232_v61 = vrot.slane %v222_v59, %v231_v57  ;;  %v241_v62 = vrot.slane %v222_v59, %v240_v58  ;;  %v637_v58 = vld [vmem:[%s1031_s1 + $0xd8] ss:$0 sm:$0xff] }
  0x21   :  { %v77_v3 = vshrl.u32 %v76_v2, 30  ;;  %v262_v2 = vsub.s32 3, %v230_v55  ;;  %v539_v55 = vld [vmem:[%s1032_s2 + $0x30] sm:$0xff] }
  0x23   :  { %v78_v4 = vshll.u32 %v77_v3, 30  ;;  %v101_v24 = vsub.s32 4, %v77_v3 }
  0x25   :  { %v79_v6 = vsub.s32 %v75_v0, %v78_v4  ;;  %v102_v27 = vsel %vm17_vm7, %v101_v24, %v77_v3  ;;  %v252_v0 = vrot.slane %v222_v59, %v251_v60  ;;  %v366_v24 = vld [vmem:[%s1031_s1 + $0x88] sm:$0xff] }
  0x26   :  { %v104_v30 = vsel %vm16_vm8, 0, %v102_v27  ;;  %v447_v27 = vld [vmem:[%s1031_s1 + $0xa0] sm:$0xff] }
  0x27   :  { %v81_v7 = vsub.s32 0, %v79_v6  ;;  %v108_v31 = vadd.s32 3, %v104_v30  ;;  %v212_v33 = vand.u32 3, %v104_v30 }
  0x29   :  { %v625_v9 = vmin.u32 %v81_v7, %v79_v6  ;;  %v109_v32 = vand.u32 3, %v108_v31  ;;  %vm217_vm10 = vcmp.eq.s32.totalorder %v212_v33, 2  ;;  %vm214_vm12 = vcmp.eq.s32.totalorder %v212_v33, 0 }
  0x2a   :  { %vm213_vm14 = vcmp.lt.s32.totalorder %v212_v33, 2 }
  0x2b   :  { %v83_v10 = vclz %v625_v9  ;;  %vm114_vm9 = vcmp.eq.s32.totalorder %v109_v32, 2  ;;  %vm111_vm11 = vcmp.eq.s32.totalorder %v109_v32, 0  ;;  %vm110_vm13 = vcmp.lt.s32.totalorder %v109_v32, 2 }
  0x2c   :  { %v263_v9 = vrot.slane %v222_v59, %v262_v2 }
  0x2d   :  { %v626_v11 = vadd.s32 4294967294, %v83_v10 }
  0x2f   :  { %vm627_vm6 = vcmp.lt.s32.totalorder %v626_v11, 0 }
  0x30   :  { %v86_v13 = vsel %vm627_vm6, 0, %v626_v11 }
  0x31   :  { %v87_v14 = vsub.s32 32, %v86_v13  ;;  %v88_v15 = vshll.u32 %v79_v6, %v86_v13  ;;  %v91_v16 = vsub.s32 4294967266, %v86_v13 }
  0x33   :  { %v89_v17 = vshrl.u32 %v71_v12, %v87_v14  ;;  %v92_v18 = vadd.s32 127, %v91_v16  ;;  %v632_v14 = vld [vmem:[%s1031_s1 + $0xe0] ss:$0 sm:$0xff] }
  0x35   :  { %v90_v19 = vor.u32 %v89_v17, %v88_v15  ;;  %v93_v20 = vshll.u32 %v92_v18, 23  ;;  %v361_v17 = vld [vmem:[%s1031_s1 + $0x60] sm:$0xff]  ;;  %v362_v18 = vld [vmem:[%s1031_s1 + $0x68] sm:$0xff] }
  0x37   :  { %v94_v21 = vor.u32 4788187, %v93_v20  ;;  %v97_v22 = vcvt.s32.f32 %v90_v19  ;;  %v769_v19 = vpack.c.bf16 %v362_v18, %v361_v17  ;;  %v363_v20 = vld [vmem:[%s1031_s1 + $0x70] sm:$0xff] }
  0x39   :  { %v95_v23 = vand.u32 2147483647, %v94_v21  ;;  %770 = vmatpush3.bf16.msra.mxu1 %v769_v19  ;;  %v364_v21 = vld [vmem:[%s1031_s1 + $0x78] sm:$0xff] }
  0x3a   :  { %771 = vmatprep.subr.bf16.mxu1 %v834_v8 }
  0x3b   :  { %v98_v25 = vmul.f32 %v97_v22, %v95_v23  ;;  %v772_v22 = vpack.c.bf16 %v364_v21, %v363_v20  ;;  %v365_v23 = vld [vmem:[%s1031_s1 + $0x80] sm:$0xff] }
  0x3d   :  { %v99_v26 = vxor.u32 2147483648, %v98_v25  ;;  %773 = vmatpush3.bf16.msra.mxu1 %v772_v22 }
  0x3e   :  { %774 = vmatprep.subr.bf16.mxu1 %v834_v8 }
  0x3f   :  { %v100_v28 = vsel %vm17_vm7, %v99_v26, %v98_v25  ;;  %v775_v25 = vpack.c.bf16 %v366_v24, %v365_v23  ;;  %v446_v26 = vld [vmem:[%s1031_s1 + $0x98] sm:$0xff] }
  0x40   :  { %v103_v29 = vsel %vm16_vm8, %v866_v1, %v100_v28  ;;  %v277_v1 = vld [vmem:[%s1031_s1 + $0x38] sm:$0xff]  ;;  %v778_v28 = vpack.c.bf16 %v447_v27, %v446_v26 }
  0x41   :  { %821 = vcosq.f32 %v103_v29  ;;  %v763_v49 = vpack.c.bf16 %v278_v48, %v277_v1  ;;  %776 = vmatpush3.bf16.msra.mxu1 %v775_v25 }
  0x42   :  { %823 = vsinq.f32 %v103_v29  ;;  %789 = vmatprep.subr.bf16.mxu1 %v834_v8  ;;  %v633_v29 = vld [vmem:[%s1031_s1 + $0x48] ss:$0 sm:$0xff] }
  0x43   :  { %764 = vmatpush3.bf16.msra.mxu0 %v763_v49  ;;  %v535_v49 = vld [vmem:[%s1032_s2 + $0x10] sm:$0xff] }
  0x44   :  { %777 = vmatprep.subr.bf16.mxu0 %v834_v8 }
  0x4b   :  { %v822_v34 = vpop.eup %821 }
  0x4c   :  { %v824_v35 = vpop.eup %823  ;;  %v115_v36 = vxor.u32 2147483648, %v822_v34 }
  0x4d   :  { %v112_v5 = vxor.u32 2147483648, %v824_v35 }
  0x4e   :  { %v116_v37 = vsel %vm114_vm9, %v115_v36, %v824_v35  ;;  %v219_v38 = vsel %vm217_vm10, %v115_v36, %v824_v35  ;;  %v449_v35 = vld [vmem:[%s1031_s1 + $0xb0] sm:$0xff] }
  0x4f   :  { %v113_v39 = vsel %vm111_vm11, %v822_v34, %v112_v5  ;;  %v216_v40 = vsel %vm214_vm12, %v822_v34, %v112_v5  ;;  %v448_v34 = vld [vmem:[%s1031_s1 + $0xa8] sm:$0xff]  ;;  %v450_v5 = vld [vmem:[%s1031_s1 + $0xb8] sm:$0xff] }
  0x50   :  { %v117_v41 = vsel %vm110_vm13, %v113_v39, %v116_v37  ;;  %v220_v42 = vsel %vm213_vm14, %v216_v40, %v219_v38  ;;  %v781_v36 = vpack.c.bf16 %v449_v35, %v448_v34  ;;  %v451_v37 = vld [vmem:[%s1031_s1 + $0xc0] sm:$0xff]  ;;  %v452_v39 = vld [vmem:[%s1031_s1 + $0xc8] sm:$0xff]  ;;  %v453_v40 = vld [vmem:[%s1031_s1 + $0xd0] sm:$0xff] }
  0x51   :  { %v118_v43 = vsel %vm107_vm15, nan, %v117_v41  ;;  %v221_v46 = vsel %vm107_vm15, nan, %v220_v42  ;;  %v784_v38 = vpack.c.bf16 %v451_v37, %v450_v5  ;;  %v787_v41 = vpack.c.bf16 %v453_v40, %v452_v39  ;;  %v533_v42 = vld [vmem:[%s1032_s2] sm:$0xff] }
  0x52   :  { %246 = vperm.xlu1 %819, %v118_v43   ;;  %v534_v43 = vld [vmem:[%s1032_s2 + $0x8] sm:$0xff] }
  0x53   :  { %v790_v44 = vpack.c.bf16 %v534_v43, %v533_v42 }
  0x56   :  { %257 = vperm.xlu1 %819, %v221_v46  }
  0x81   :  { %v227_v56 = vpop.permute.xlu0 %226 }
  0x82   :  { %v233_v3 = vmul.f32 %v232_v61, %v227_v56  ;;  %v540_v56 = vld [vmem:[%s1032_s2 + $0x38] sm:$0xff] }
  0x83   :  { %v799_v57 = vpack.c.bf16 %v540_v56, %v539_v55 }
  0x86   :  { %v236_v63 = vpop.permute.xlu0 %235 }
  0x87   :  { %v242_v4 = vmul.f32 %v241_v62, %v236_v63  ;;  %v639_v63 = vld [vmem:[%s1032_s2 + $0x40] ss:$0 sm:$0xff] }
  0x89   :  { %v243_v10 = vadd.f32 %v242_v4, %v233_v3 }
  0xd1   :  { %v247_v6 = vpop.permute.xlu1 %246 }
  0xd2   :  { %v253_v7 = vmul.f32 %v252_v0, %v247_v6 }
  0xd4   :  { %v254_v12 = vadd.f32 %v253_v7, %v243_v10 }
  0xd5   :  { %v258_v11 = vpop.permute.xlu1 %257 }
  0xd6   :  { %v264_v13 = vmul.f32 %v263_v9, %v258_v11 }
  0xd8   :  { %v265_v15 = vadd.f32 %v264_v13, %v254_v12 }
  0xda   :  { %v270_v16 = vadd.f32 %v632_v14, %v265_v15 }
  0xdc   :  { %694 = vmatmul.mubr.msk.f32.vlgmr.msra.gmra.mrb[0].mxu0 %vm284_vm1, %v270_v16 }
  0xdd   :  { %731 = vmatprep.mubr.msk.f32.mxu0 %vm841_vm0, %v842_v50  ;;  %779 = vmatpush3.bf16.msra.mxu0 %v778_v28 }
  0xde   :  { %780 = vmatprep.subr.bf16.mxu0 %v834_v8 }
  0xe1   :  { %782 = vmatpush3.bf16.msra.mxu0 %v781_v36 }
  0xe2   :  { %783 = vmatprep.subr.bf16.mxu0 %v834_v8 }
  0xe5   :  { %785 = vmatpush3.bf16.msra.mxu0 %v784_v38 }
  0xe6   :  { %786 = vmatprep.subr.bf16.mxu0 %v834_v8 }
  0xe9   :  { %788 = vmatpush3.bf16.msra.mxu0 %v787_v41 }
 0x1af   :  { %v354_v30 = vpop.f32.mrb[0].mxu0 }
 0x1b0   :  { %v355_v31 = vadd.f32 %v633_v29, %v354_v30  ;;  %v695_v32 = vpop.f32.mrb[1].mxu0 }
 0x1b2   :  { %825 = vtanh.f32 %v355_v31 }
 0x1bc   :  { %v826_v33 = vpop.eup %825 }
 0x1bd   :  { %713 = vmatmul.mubr.msk.f32.vlgmr.msra.gmra.mrb[0].mxu1 %vm284_vm1, %v826_v33 }
 0x1be   :  { %750 = vmatprep.mubr.msk.f32.mxu1 %vm841_vm0, %v842_v50  ;;  %791 = vmatpush3.bf16.msra.mxu1 %v790_v44  ;;  %v536_v50 = vld [vmem:[%s1032_s2 + $0x18] sm:$0xff] }
 0x1bf   :  { %792 = vmatprep.subr.bf16.mxu1 %v834_v8  ;;  %v793_v51 = vpack.c.bf16 %v536_v50, %v535_v49 }
 0x1c2   :  { %794 = vmatpush3.bf16.msra.mxu1 %v793_v51 }
 0x1c3   :  { %795 = vmatprep.subr.bf16.mxu1 %v834_v8 }
 0x1c6   :  { %797 = vmatpush3.bf16.msra.mxu1 %v796_v54 }
 0x1c7   :  { %798 = vmatprep.subr.bf16.mxu1 %v834_v8 }
 0x1ca   :  { %800 = vmatpush3.bf16.msra.mxu1 %v799_v57 }
 0x290   :  { %v441_v46 = vpop.f32.mrb[0].mxu1 }
 0x291   :  { %v442_v47 = vadd.f32 %v635_v45, %v441_v46  ;;  %v714_v1 = vpop.f32.mrb[1].mxu1 }
 0x293   :  { %827 = vtanh.f32 %v442_v47 }
 0x29d   :  { %v828_v48 = vpop.eup %827 }
 0x29e   :  { %732 = vmatmul.mubr.msk.f32.vlgmr.msra.gmra.mrb[2].mxu0 %vm284_vm1, %v828_v48 }
 0x371   :  { %v528_v59 = vpop.f32.mrb[2].mxu0 }
 0x372   :  { %v529_v60 = vadd.f32 %v637_v58, %v528_v59  ;;  %v733_v61 = vpop.f32.mrb[3].mxu0 }
 0x374   :  { %829 = vtanh.f32 %v529_v60 }
 0x37e   :  { %v830_v62 = vpop.eup %829 }
 0x37f   :  { %751 = vmatmul.mubr.msk.f32.vlgmr.msra.gmra.mrb[2].mxu1 %vm284_vm1, %v830_v62 }
 0x452   :  { %v615_v0 = vpop.f32.mrb[2].mxu1 }
 0x453   :  { %v616_v2 = vadd.f32 %v639_v63, %v615_v0  ;;  %v752_v3 = vpop.f32.mrb[3].mxu1 }
 0x455   :  { %619 = vst [vmem:[%s1033_s3] sm:$0xff] %v616_v2 }

</bundles_post_ra>
